<compile_context>
chip_gen: v7x
topology: tpu7x:2x2x1
jax: 0.10.0
libtpu: 0.0.40
codegen_flags: <defaults>
</compile_context>

<pallas_src>
import jax
import jax.numpy as jnp
from jax.experimental import pallas as pl
from jax.experimental.pallas import tpu as pltpu


def _make_kernel(n_chunks):
    def kernel(*refs):
        x_refs = refs[:n_chunks]                 # each (TB, F_i)  VMEM
        w_refs = refs[n_chunks:2 * n_chunks]     # each (1,  F_i)  VMEM (resident)
        b_ref = refs[2 * n_chunks]               # (1, 1)          SMEM
        o_ref = refs[2 * n_chunks + 1]           # (TB, 1)         VMEM

        acc = None
        for x_ref, w_ref in zip(x_refs, w_refs):
            # VPU broadcast-multiply + XLU cross-lane reduce, explicit f32
            # accumulation (identical numerics on v5e where the VPU has no
            # bf16 path). keepdims keeps batch on sublanes -> the (TB, 1)
            # store needs no per-step transpose.
            part = jnp.sum(
                x_ref[...].astype(jnp.float32) * w_ref[...].astype(jnp.float32),
                axis=-1,
                keepdims=True,
            )                                    # (TB, 1)
            acc = part if acc is None else acc + part
        o_ref[...] = (acc + b_ref[0, 0]).astype(o_ref.dtype)

    return kernel


def _vmem_limits():
    """(pipeline-buffer budget, scoped-VMEM limit handed to Mosaic), both in
    bytes, derived from the actual chip so v7x (64 MiB physical per TC) gets
    headroom while v5e/v6e (128 MiB) use a larger sweet spot."""
    try:
        cap = int(pltpu.get_tpu_info().vmem_capacity_bytes)
    except Exception:
        cap = 64 << 20  # conservative fallback (v7x physical per-TC)
    budget = max(8 << 20, min(24 << 20, cap // 4))
    limit = min(cap // 2, 32 << 20)
    return budget, max(limit, budget + (4 << 20))


def _pick_batch_tile(batch, row_bytes, vmem_budget_bytes,
                     target_step_bytes=4 << 20):
    """Rows per grid step.

    Sized from a per-step byte target (~4 MiB of activation DMA per pipeline
    buffer) so the ~0.35us fixed per-step overhead is amortized even for
    narrow feature widths, and capped so the double-buffered activation tiles
    (+ the tiny (TB,1) output tiles) fit inside the VMEM budget on every
    generation.
    """
    out_row_bytes = 2 * 4  # double-buffered (TB, 1) f32 output rows
    rows_budget = vmem_budget_bytes // max(1, 2 * row_bytes + out_row_bytes)
    rows_target = max(1, target_step_bytes // max(1, row_bytes))
    rows = min(rows_budget, rows_target)
    rows = max(8, (rows // 8) * 8)
    if 2 * 8 * row_bytes > vmem_budget_bytes:
        # TODO(synk): add a feature-axis ("arbitrary", last) reduction grid
        # with an f32 accumulator scratch for very wide chunks instead of
        # refusing; needed so the minimum tile never exceeds v7x's VMEM.
        raise ValueError(
            "feature width too large for the VMEM budget; needs K-tiling")
    if batch <= rows:
        return batch              # single full tile (block == full array extent)
    return rows                   # multiple of 8 -> valid sublane tiling


def trainable_linear_forward(xs, weight, bias):
    """Pallas equivalent of TrainableLinearModel.forward.

    xs     : tuple/list of arrays, each [B, F_i] (logically concatenated on axis=1)
    weight : [1, F] with F = sum(F_i)  (PyTorch nn.Linear layout)
    bias   : [1]
    returns: tuple with one element of shape [B, 1]
    """
    xs = tuple(xs)
    n = len(xs)
    B = int(xs[0].shape[0])
    feats = [int(x.shape[1]) for x in xs]
    assert all(int(x.shape[0]) == B for x in xs)
    F = sum(feats)
    assert weight.shape == (1, F)

    out_dtype = jnp.result_type(*(x.dtype for x in xs), weight.dtype)

    # Per-chunk weight rows, kept lane-major [1, F_i] in f32 (tiny, one-time).
    w_chunks = []
    off = 0
    for f in feats:
        w_chunks.append(weight[:, off:off + f].astype(jnp.float32))
        off += f
    b = bias.reshape(1, 1).astype(jnp.float32)

    # Activation bytes per batch row, summed over chunks, in *native* dtypes
    # (no wrapper upcast -> bf16 callers keep halved HBM traffic).
    row_bytes = sum(f * jnp.dtype(x.dtype).itemsize for f, x in zip(feats, xs))

    vmem_budget, vmem_limit = _vmem_limits()
    TB = _pick_batch_tile(B, row_bytes, vmem_budget)
    num_tiles = pl.cdiv(B, TB)

    in_specs = [pl.BlockSpec((TB, f), lambda i: (i, 0)) for f in feats]
    # Constant index_map -> the pipeliner DMAs each weight row once, not per tile.
    in_specs += [pl.BlockSpec((1, f), lambda i: (0, 0)) for f in feats]
    in_specs.append(pl.BlockSpec(memory_space=pltpu.SMEM))

    cost = pl.CostEstimate(
        flops=2 * B * F,
        transcendentals=0,
        bytes_accessed=B * row_bytes + 4 * F + 4 + 4 * B,
    )

    out = pl.pallas_call(
        _make_kernel(n),
        out_shape=jax.ShapeDtypeStruct((num_tiles * TB, 1), jnp.float32),
        grid_spec=pl.GridSpec(
            grid=(num_tiles,),
            in_specs=in_specs,
            out_specs=pl.BlockSpec((TB, 1), lambda i: (i, 0)),
        ),
        compiler_params=pltpu.CompilerParams(
            # "parallel" lets the batch-tile axis shard across the two
            # TensorCores on v7x; a no-op on single-TC v5e/v6e.
            dimension_semantics=("parallel",),
            vmem_limit_bytes=vmem_limit,
        ),
        cost_estimate=cost,
    )(*xs, *w_chunks, b)

    # Drop padded rows from the boundary tile; no relayout, no compute.
    y = out[:B].astype(out_dtype)
    return (y,)


if __name__ == "__main__":
    key = jax.random.PRNGKey(0)
    k_x1, k_x2, k_w, k_b = jax.random.split(key, 4)

    batch = 8
    f1, f2 = 16, 16
    num_features = f1 + f2  # model built with num_features = 32

    # Two inputs to exercise the torch.cat(x, dim=1) branch.
    x1 = jax.random.normal(k_x1, (batch, f1), dtype=jnp.float32)
    x2 = jax.random.normal(k_x2, (batch, f2), dtype=jnp.float32)

    # Deterministic nn.Linear-style init: U(-1/sqrt(F), 1/sqrt(F))
    bound = 1.0 / (num_features ** 0.5)
    weight = jax.random.uniform(
        k_w, (1, num_features), minval=-bound, maxval=bound, dtype=jnp.float32
    )
    bias = jax.random.uniform(
        k_b, (1,), minval=-bound, maxval=bound, dtype=jnp.float32
    )

    (y,) = trainable_linear_forward((x1, x2), weight, bias)
    y = jax.block_until_ready(y)

    # Sanity check against plain JAX reference.
    x_cat = jnp.concatenate([x1, x2], axis=1)
    y_ref = x_cat @ weight.T + bias
    assert y.shape == (batch, 1)
    assert jnp.allclose(y, y_ref, atol=1e-5, rtol=1e-5)

    print("KERNEL_OK")
</pallas_src>

<mosaic_0001>
module attributes {stable_mosaic.version = 11 : i64} {
  func.func @kernel(%arg0: i32, %arg1: memref<8x16xf32, #tpu.memory_space<vmem>>, %arg2: memref<8x16xf32, #tpu.memory_space<vmem>>, %arg3: memref<1x16xf32, #tpu.memory_space<vmem>>, %arg4: memref<1x16xf32, #tpu.memory_space<vmem>>, %arg5: memref<1x1xf32, #tpu.memory_space<smem>>, %arg6: memref<8x1xf32, #tpu.memory_space<vmem>>) attributes {dimension_semantics = [#tpu.dimension_semantics<parallel>], iteration_bounds = array<i64: 1>, scalar_prefetch = 0 : i64, scratch_operands = 0 : i64, tpu.core_type = #tpu.core_type<tc>, window_params = [{transform_indices = @transform_0, window_bounds = array<i64: 8, 16>}, {transform_indices = @transform_1, window_bounds = array<i64: 8, 16>}, {pipeline_mode = #tpu.pipeline_mode<synchronous>, transform_indices = @transform_2, window_bounds = array<i64: 1, 16>}, {pipeline_mode = #tpu.pipeline_mode<synchronous>, transform_indices = @transform_3, window_bounds = array<i64: 1, 16>}, {transform_indices = @transform_4, window_bounds = array<i64: 1, 1>}, {transform_indices = @transform_5, window_bounds = array<i64: 8, 1>}]} {
    %c0 = arith.constant 0 : index
    %c0_0 = arith.constant 0 : index
    %0 = vector.load %arg1[%c0, %c0_0] : memref<8x16xf32, #tpu.memory_space<vmem>>, vector<8x16xf32>
    %c0_1 = arith.constant 0 : index
    %c0_2 = arith.constant 0 : index
    %1 = vector.load %arg3[%c0_1, %c0_2] : memref<1x16xf32, #tpu.memory_space<vmem>>, vector<1x16xf32>
    %2 = vector.broadcast %1 : vector<1x16xf32> to vector<8x16xf32>
    %3 = arith.mulf %0, %2 : vector<8x16xf32>
    %cst = arith.constant dense<0.000000e+00> : vector<8xf32>
    %4 = vector.multi_reduction <add>, %3, %cst [1] : vector<8x16xf32> to vector<8xf32>
    %5 = vector.shape_cast %4 : vector<8xf32> to vector<8x1xf32>
    %c0_3 = arith.constant 0 : index
    %c0_4 = arith.constant 0 : index
    %6 = vector.load %arg2[%c0_3, %c0_4] : memref<8x16xf32, #tpu.memory_space<vmem>>, vector<8x16xf32>
    %c0_5 = arith.constant 0 : index
    %c0_6 = arith.constant 0 : index
    %7 = vector.load %arg4[%c0_5, %c0_6] : memref<1x16xf32, #tpu.memory_space<vmem>>, vector<1x16xf32>
    %8 = vector.broadcast %7 : vector<1x16xf32> to vector<8x16xf32>
    %9 = arith.mulf %6, %8 : vector<8x16xf32>
    %cst_7 = arith.constant dense<0.000000e+00> : vector<8xf32>
    %10 = vector.multi_reduction <add>, %9, %cst_7 [1] : vector<8x16xf32> to vector<8xf32>
    %11 = vector.shape_cast %10 : vector<8xf32> to vector<8x1xf32>
    %12 = arith.addf %5, %11 : vector<8x1xf32>
    %c0_8 = arith.constant 0 : index
    %c0_9 = arith.constant 0 : index
    %13 = memref.load %arg5[%c0_8, %c0_9] : memref<1x1xf32, #tpu.memory_space<smem>>
    %14 = vector.broadcast %13 : f32 to vector<8x1xf32>
    %15 = arith.addf %12, %14 : vector<8x1xf32>
    %c0_10 = arith.constant 0 : index
    %c0_11 = arith.constant 0 : index
    %16 = vector.load %arg6[%c0_10, %c0_11] : memref<8x1xf32, #tpu.memory_space<vmem>>, vector<8x1xf32>
    tpu.vector_store %arg6[%c0_10, %c0_11], %15 {strides = array<i32>} : memref<8x1xf32, #tpu.memory_space<vmem>>, vector<8x1xf32>,
    return
  }
  func.func @transform_0(%arg0: i32) -> (i32, i32) {
    %c0_i32 = arith.constant 0 : i32
    %c0_i32_0 = arith.constant 0 : i32
    return %arg0, %c0_i32 : i32, i32
  }
  func.func @transform_1(%arg0: i32) -> (i32, i32) {
    %c0_i32 = arith.constant 0 : i32
    %c0_i32_0 = arith.constant 0 : i32
    return %arg0, %c0_i32 : i32, i32
  }
  func.func @transform_2(%arg0: i32) -> (i32, i32) {
    %c0_i32 = arith.constant 0 : i32
    %c0_i32_0 = arith.constant 0 : i32
    %c0_i32_1 = arith.constant 0 : i32
    return %c0_i32, %c0_i32_0 : i32, i32
  }
  func.func @transform_3(%arg0: i32) -> (i32, i32) {
    %c0_i32 = arith.constant 0 : i32
    %c0_i32_0 = arith.constant 0 : i32
    %c0_i32_1 = arith.constant 0 : i32
    return %c0_i32, %c0_i32_0 : i32, i32
  }
  func.func @transform_4(%arg0: i32) -> (i32, i32) {
    %c0_i32 = arith.constant 0 : i32
    %c0_i32_0 = arith.constant 0 : i32
    %c0_i32_1 = arith.constant 0 : i32
    return %c0_i32, %c0_i32_0 : i32, i32
  }
  func.func @transform_5(%arg0: i32) -> (i32, i32) {
    %c0_i32 = arith.constant 0 : i32
    %c0_i32_0 = arith.constant 0 : i32
    return %arg0, %c0_i32 : i32, i32
  }
}

</mosaic_0001>

<bundles_post_ra>
// kernel: tpu_custom_call.1
= control target key start
LH: loop header
LB: loop body
LE: loop exit
PB: predicated region body
PF: predicated region fallthrough
CT: control target
= control target key end

     0   :  { %11 = vsyncpa [#allocation4], 0  ;;  %s202_s0 = inlined_call_operand.hbm [shape: f32[8,16], index: 0, kind: input, shape index: {}]   ;;  %s203_s1 = inlined_call_operand.hbm [shape: f32[8,16], index: 1, kind: input, shape index: {}]   ;;  %s204_s2 = inlined_call_operand.vmem [shape: f32[1,16], index: 2, kind: input, shape index: {}]   ;;  %s205_s3 = inlined_call_operand.vmem [shape: f32[1,16], index: 3, kind: input, shape index: {}]   ;;  %s206_s4 = inlined_call_operand.<no memory space> [shape: f32[1,1], index: 4, kind: input, shape index: {}]   ;;  %s207_s5 = inlined_call_operand.vmem [shape: f32[8,1], index: 5, kind: output, shape index: {}]  }
   0x1   :  { %12 = vsyncpa [#allocation6], 0  ;;  %s134_s18 = smov [#allocation3]   ;;  %s135_s20 = smov [#allocation5]  }
   0x2   :  { %s19_s19 = sshll.u32 %s134_s18, 4  ;;  %s29_s21 = sshll.u32 %s135_s20, 4  ;;  %s20_s19 = int_to_ptr.vmem [resolvable:$true] %s19_s19  ;;  %s30_s21 = int_to_ptr.vmem [resolvable:$true] %s29_s21 }
   0x3   :  { %s86_s24 = scalar_lea.hbm %s202_s0, 128 }
   0x4   :  { %p87_p0 = scmp.ne.s32.totalorder %s202_s0, %s86_s24  ;;  %p90_p1 = scmp.lt.u32.totalorder %s86_s24, %s202_s0 }
   0x6   :  { %p92_p2 = pnand %p90_p1, %p87_p0 }
   0x8   :  { %95 = shalt.err (!%p92_p2)
}
   0x9   :  { %s96_s29 = scalar_lea.vmem %s20_s19, 128  ;;  %p101_p4 = scmp.lt.s32.totalorder %s20_s19, %s20_s19 }
   0xa   :  { %p97_p3 = scmp.ne.s32.totalorder %s20_s19, %s96_s29  ;;  %p102_p5 = scmp.lt.s32.totalorder %s96_s29, %s96_s29 }
   0xc   :  { %p103_p6 = por %p102_p5, %p101_p4 }
   0xe   :  { %p104_p7 = pnand %p103_p6, %p97_p3 }
  0x10   :  { %107 = shalt.err (!%p104_p7)
}
  0x11   :  { %22 = dma.hbm_to_vmem [thread:$0]  %s202_s0, 128, %s20_s19, [#allocation4]  }
  0x12   :  { %s108_s9 = scalar_lea.hbm %s203_s1, 128 }
  0x13   :  { %p109_p8 = scmp.ne.s32.totalorder %s203_s1, %s108_s9  ;;  %p112_p9 = scmp.lt.u32.totalorder %s108_s9, %s203_s1 }
  0x15   :  { %p114_p10 = pnand %p112_p9, %p109_p8 }
  0x17   :  { %117 = shalt.err (!%p114_p10)
}
  0x18   :  { %s118_s14 = scalar_lea.vmem %s30_s21, 128  ;;  %p123_p12 = scmp.lt.s32.totalorder %s30_s21, %s30_s21 }
  0x19   :  { %p119_p11 = scmp.ne.s32.totalorder %s30_s21, %s118_s14  ;;  %p124_p13 = scmp.lt.s32.totalorder %s118_s14, %s118_s14 }
  0x1b   :  { %p125_p0 = por %p124_p13, %p123_p12 }
  0x1d   :  { %p126_p1 = pnand %p125_p0, %p119_p11 }
  0x1f   :  { %129 = shalt.err (!%p126_p1)
}
  0x20   :  { %32 = dma.hbm_to_vmem [thread:$0]  %s203_s1, 128, %s30_s21, [#allocation6]  }
  0x21   :  { %130 = dma.done.wait [#allocation4], 128  }
  0x22   :  { %131 = vsyncadd [#allocation4], 4294967168 }
  0x23   :  { %132 = dma.done.wait [#allocation6], 128  }
  0x24   :  { %133 = vsyncadd [#allocation6], 4294967168  ;;  %v45_v0 = vld [vmem:[#allocation3] sm:$0xff]  ;;  %vm54_vm0 = vcmask 130048   ;;  %v58_v2 = vld [vmem:[#allocation5] sm:$0xff]  ;;  %v72_v9 = vstv %s206_s4  ;;  %vm74_vm1 = vcmask 7168  }
  0x25   :  { %v82_v1 = vld [vmem:[%s204_s2] ss:$0 sm:$0xff] }
  0x26   :  { %v53_v3 = vmul.f32 %v82_v1, %v45_v0  ;;  %v83_v4 = vld [vmem:[%s205_s3] ss:$0 sm:$0xff] }
  0x27   :  { %v66_v5 = vmul.f32 %v83_v4, %v58_v2 }
  0x28   :  { %v55_v6 = vsel %vm54_vm0, %v53_v3, 0.0 }
  0x29   :  { %56 = vadd.xlane.f32.xlu0 %v55_v6  ;;  %v67_v7 = vsel %vm54_vm0, %v66_v5, 0.0 }
  0x2d   :  { %68 = vadd.xlane.f32.xlu0 %v67_v7 }
  0xb6   :  { %v57_v8 = vpop.xlane.xlu0 %56 }
  0xba   :  { %v69_v10 = vpop.xlane.xlu0 %68 }
  0xbb   :  { %v70_v11 = vadd.f32 %v69_v10, %v57_v8 }
  0xbd   :  { %v73_v12 = vadd.f32 %v72_v9, %v70_v11 }
  0xbf   :  { %75 = vst.msk [vmem:[%s207_s5] sm:$0xff] %vm74_vm1, %v73_v12 }
  0xc0   :  { %80 = vsyncpa [#allocation4], 1 }
  0xc1   :  { %81 = vsyncpa [#allocation6], 1 }

</bundles_post_ra>
